<compile_context>
chip_gen: v5e
topology: v5e:2x2
jax: 0.10.0
libtpu: 0.0.40
codegen_flags: <defaults>
</compile_context>

<pallas_src>
import functools
import math

import jax
import jax.numpy as jnp
from jax import lax
from jax.experimental import pallas as pl
from jax.experimental.pallas import tpu as pltpu


def _pick_tile(dim, target, align):
    """Largest tile <= target that divides `dim` and is a multiple of `align`.
    Falls back to the full dim (always a legal block size)."""
    if dim <= target:
        return dim
    start = (target // align) * align
    for t in range(start, 0, -align):
        if dim % t == 0:
            return t
    return dim


# ----------------------------------------------------------------------------
# Tiled linear kernels:  Y = X @ W (+ b)      (W stored as (Cin, Cout))
# ----------------------------------------------------------------------------
def _matmul_kernel(x_ref, w_ref, o_ref, acc_ref):
    @pl.when(pl.program_id(2) == 0)
    def _():
        acc_ref[...] = jnp.zeros_like(acc_ref)

    acc_ref[...] += jnp.dot(x_ref[...], w_ref[...],
                            preferred_element_type=jnp.float32)

    @pl.when(pl.program_id(2) == pl.num_programs(2) - 1)
    def _():
        o_ref[...] = acc_ref[...].astype(o_ref.dtype)


def _matmul_bias_kernel(x_ref, w_ref, b_ref, o_ref, acc_ref):
    @pl.when(pl.program_id(2) == 0)
    def _():
        acc_ref[...] = jnp.zeros_like(acc_ref)

    acc_ref[...] += jnp.dot(x_ref[...], w_ref[...],
                            preferred_element_type=jnp.float32)

    @pl.when(pl.program_id(2) == pl.num_programs(2) - 1)
    def _():
        o_ref[...] = (acc_ref[...] + b_ref[...]).astype(o_ref.dtype)


def pallas_linear(x2d, w, b=None, *, tm=256, tn=512, tk=512):
    """x2d: (M, K), w: (K, N), b: (N,) or None -> (M, N)."""
    M, K = x2d.shape
    N = w.shape[1]
    TM = _pick_tile(M, tm, 8)
    TN = _pick_tile(N, tn, 128)
    TK = _pick_tile(K, tk, 128)
    grid = (M // TM, N // TN, K // TK)

    in_specs = [
        pl.BlockSpec((TM, TK), lambda i, j, k: (i, k)),
        pl.BlockSpec((TK, TN), lambda i, j, k: (k, j)),
    ]
    args = [x2d, w]
    if b is None:
        kernel = _matmul_kernel           # qkv Linear has bias=False: skip the add
    else:
        kernel = _matmul_bias_kernel
        in_specs.append(pl.BlockSpec((1, TN), lambda i, j, k: (0, j)))
        args.append(b.reshape(1, N))

    return pl.pallas_call(
        kernel,
        out_shape=jax.ShapeDtypeStruct((M, N), x2d.dtype),
        grid=grid,
        in_specs=in_specs,
        out_specs=pl.BlockSpec((TM, TN), lambda i, j, k: (i, j)),
        scratch_shapes=[pltpu.VMEM((TM, TN), jnp.float32)],
        compiler_params=pltpu.CompilerParams(
            dimension_semantics=("parallel", "parallel", "arbitrary")),
    )(*args)


# ----------------------------------------------------------------------------
# Head-fused dual attention kernel (one grid step = one batch x one query tile,
# all heads). Computes, per head h:
#   attn1 = softmax( (scale*qx)  @ kx^T) ; attnx = softmax((-scale*qyo) @ kx^T)
#   attn2 = softmax( (scale*qy)  @ ky^T) ; attny = softmax((-scale*qxo) @ ky^T)
#   xo = attn1@vx + attnx@vx ,  yo = attn2@vy + attny@vy    (vy == vx, see NOTE)
# and writes lane-dense (TQ, C) slabs for the x- and y-streams.
# ----------------------------------------------------------------------------
def _dif_attn_kernel(qxo_ref, qx_ref, kx_ref, vx_ref, qyo_ref, qy_ref, ky_ref,
                     out_ref, *, num_heads, scale):
    TQ, C = qx_ref.shape
    D = C // num_heads
    # Contract last dims of both operands: (M, D) x (N, D) -> (M, N), no .T.
    dn = (((1,), (1,)), ((), ()))

    for h in range(num_heads):
        sl = slice(h * D, (h + 1) * D)

        # Fold scale / negation into the small (TQ, D) query operands.
        qx = qx_ref[:, sl] * scale
        qyo = qyo_ref[:, sl] * (-scale)
        qy = qy_ref[:, sl] * scale
        qxo = qxo_ref[:, sl] * (-scale)

        kx = kx_ref[:, sl]
        ky = ky_ref[:, sl]
        # NOTE: the PyTorch reference deliberately binds vy = qkv[3] (i.e. the
        # x-stream value tensor); reproduced exactly, so vx serves both streams.
        vx = vx_ref[:, sl]

        # Two stacked QK^T matmuls instead of four: [attn1; attnx] and [attn2; attny].
        s_x = lax.dot_general(jnp.concatenate([qx, qyo], axis=0), kx, dn,
                              preferred_element_type=jnp.float32)   # (2TQ, N)
        s_y = lax.dot_general(jnp.concatenate([qy, qxo], axis=0), ky, dn,
                              preferred_element_type=jnp.float32)   # (2TQ, N)
        s = jnp.concatenate([s_x, s_y], axis=0)                      # (4TQ, N)

        # Row softmax in f32. Reciprocal on the EUP (approx) + one Newton step
        # on the (4TQ, 1) column to recover ~f32 accuracy cheaply.
        m = jnp.max(s, axis=-1, keepdims=True)
        e = jnp.exp(s - m)
        denom = jnp.sum(e, axis=-1, keepdims=True)
        r = pl.reciprocal(denom, approx=True)
        r = r * (2.0 - denom * r)
        p = e * r

        # One stacked PV matmul: (4TQ, N) @ (N, D).
        o = jnp.dot(p.astype(vx.dtype), vx, preferred_element_type=jnp.float32)

        xo = o[0 * TQ:1 * TQ] + o[1 * TQ:2 * TQ]   # attn1@vx + attnx@vx
        yo = o[2 * TQ:3 * TQ] + o[3 * TQ:4 * TQ]   # attn2@vy + attny@vy
        out_ref[0, :, sl] = xo.astype(out_ref.dtype)
        out_ref[1, :, sl] = yo.astype(out_ref.dtype)


def pallas_dif_attention(qkv, *, num_heads, scale, tq=256):
    """qkv: (2, B, N, 4*C) merged QKV projection of [x; y].
    Returns (2, B, N, C): index 0 = x-stream output, 1 = y-stream output."""
    _, B, N, C4 = qkv.shape
    C = C4 // 4
    TQ = _pick_tile(N, tq, 8)
    grid = (B, N // TQ)

    # Feed the kernel straight from the (2, B, N, 4C) tensor: the index maps
    # select the stream (x/y) and the qkv slot (qo/q/k/v) — no host-side permute.
    def q_spec(stream, idx):
        return pl.BlockSpec((None, None, TQ, C),
                            lambda b, qi, s=stream, i=idx: (s, b, qi, i))

    def kv_spec(stream, idx):
        return pl.BlockSpec((None, None, N, C),
                            lambda b, qi, s=stream, i=idx: (s, b, 0, i))

    in_specs = [
        q_spec(0, 0),    # qxo
        q_spec(0, 1),    # qx
        kv_spec(0, 2),   # kx
        kv_spec(0, 3),   # vx (also used as vy, per reference)
        q_spec(1, 0),    # qyo
        q_spec(1, 1),    # qy
        kv_spec(1, 2),   # ky
    ]

    kernel = functools.partial(_dif_attn_kernel, num_heads=num_heads, scale=scale)
    return pl.pallas_call(
        kernel,
        out_shape=jax.ShapeDtypeStruct((2, B, N, C), qkv.dtype),
        grid=grid,
        in_specs=in_specs,
        # Lane-dense (2, TQ, C) output slab per step (no masked partial stores).
        out_specs=pl.BlockSpec((2, None, TQ, C), lambda b, qi: (0, b, qi, 0)),
        compiler_params=pltpu.CompilerParams(
            dimension_semantics=("parallel", "parallel")),
    )(qkv, qkv, qkv, qkv, qkv, qkv, qkv)


# ----------------------------------------------------------------------------
# Full DifAttention forward
# ----------------------------------------------------------------------------
def dif_attention_forward(x, y, params, num_heads):
    B, N, C = x.shape
    D = C // num_heads
    scale = D ** (-0.5)

    w_qkv = params["w_qkv"]     # (C, 4C), pre-transposed
    w_proj = params["w_proj"]   # (C, C)
    b_proj = params["b_proj"]   # (C,)

    # Merged QKV projection of both streams: one tiled matmul on (2*B*N, C).
    xy = jnp.concatenate([x, y], axis=0).reshape(2 * B * N, C)
    qkv = pallas_linear(xy, w_qkv, None)            # (2BN, 4C), no bias
    qkv = qkv.reshape(2, B, N, 4 * C)               # free contiguous reshape

    # Head-fused attention; outputs are already (stream, B, N, C) lane-dense.
    att = pallas_dif_attention(qkv, num_heads=num_heads, scale=scale)

    # Merged output projection of both streams (same proj weights, as in module).
    out = pallas_linear(att.reshape(2 * B * N, C), w_proj, b_proj)
    out = out.reshape(2, B, N, C)
    return out[0], out[1]


# ----------------------------------------------------------------------------
# Pure-JAX reference (mirrors the PyTorch forward exactly, eval mode)
# ----------------------------------------------------------------------------
def dif_attention_reference(x, y, params, num_heads):
    B, N, C = x.shape
    H = num_heads
    D = C // H
    scale = D ** (-0.5)
    w_qkv, w_proj, b_proj = params["w_qkv"], params["w_proj"], params["b_proj"]

    def split(inp):
        q = (inp.reshape(B * N, C) @ w_qkv).reshape(B, N, 4, H, D)
        q = q.transpose(2, 0, 3, 1, 4)
        return q[0], q[1], q[2], q[3]

    qxo, qx, kx, vx = split(x)
    qyo, qy, ky, _ = split(y)
    vy = vx   # as in the PyTorch module (qkv[3] reused)

    sm = jax.nn.softmax
    a1 = sm(jnp.einsum("bhnd,bhmd->bhnm", qx, kx) * scale, axis=-1)
    a2 = sm(jnp.einsum("bhnd,bhmd->bhnm", qy, ky) * scale, axis=-1)
    ax = sm(-jnp.einsum("bhnd,bhmd->bhnm", qyo, kx) * scale, axis=-1)
    ay = sm(-jnp.einsum("bhnd,bhmd->bhnm", qxo, ky) * scale, axis=-1)

    ox = jnp.einsum("bhnm,bhmd->bhnd", a1, vx) + jnp.einsum("bhnm,bhmd->bhnd", ax, vx)
    oy = jnp.einsum("bhnm,bhmd->bhnd", a2, vy) + jnp.einsum("bhnm,bhmd->bhnd", ay, vy)

    ox = ox.transpose(0, 2, 1, 3).reshape(B, N, C)
    oy = oy.transpose(0, 2, 1, 3).reshape(B, N, C)
    return ox @ w_proj + b_proj, oy @ w_proj + b_proj


# ----------------------------------------------------------------------------
if __name__ == "__main__":
    # Small but layout-friendly shapes: head_dim = C // H = 128, so every
    # per-head lane slice is a full 128-lane tile (no masked partial accesses).
    B, N, C, H = 2, 32, 256, 2

    key = jax.random.PRNGKey(0)
    k_x, k_y, k_qkv, k_pw, k_pb = jax.random.split(key, 5)

    x = jax.random.normal(k_x, (B, N, C), dtype=jnp.float32)
    y = jax.random.normal(k_y, (B, N, C), dtype=jnp.float32)

    # Deterministic parameter init (PyTorch-style uniform bounds), stored
    # pre-transposed as (Cin, Cout) for the kernels. qkv Linear has no bias.
    bound = 1.0 / math.sqrt(C)
    params = {
        "w_qkv": jax.random.uniform(k_qkv, (C, 4 * C), jnp.float32, -bound, bound),
        "w_proj": jax.random.uniform(k_pw, (C, C), jnp.float32, -bound, bound),
        "b_proj": jax.random.uniform(k_pb, (C,), jnp.float32, -bound, bound),
    }

    x_out, y_out = dif_attention_forward(x, y, params, num_heads=H)
    jax.block_until_ready((x_out, y_out))

    x_ref, y_ref = dif_attention_reference(x, y, params, num_heads=H)
    assert x_out.shape == (B, N, C) and y_out.shape == (B, N, C)
    # Tolerance accounts for the EUP approximate-reciprocal (+ one Newton step)
    # softmax normalization and tiled-K f32 accumulation order.
    assert jnp.allclose(x_out, x_ref, atol=1e-4, rtol=1e-4), float(
        jnp.max(jnp.abs(x_out - x_ref)))
    assert jnp.allclose(y_out, y_ref, atol=1e-4, rtol=1e-4), float(
        jnp.max(jnp.abs(y_out - y_ref)))

    print("KERNEL_OK")
</pallas_src>

<mosaic_0001>
module attributes {stable_mosaic.version = 11 : i64} {
  func.func @_matmul_kernel(%arg0: i32, %arg1: i32, %arg2: i32, %arg3: memref<128x256xf32, #tpu.memory_space<vmem>>, %arg4: memref<256x512xf32, #tpu.memory_space<vmem>>, %arg5: memref<128x512xf32, #tpu.memory_space<vmem>>, %arg6: memref<128x512xf32, #tpu.memory_space<vmem>>) attributes {dimension_semantics = [#tpu.dimension_semantics<parallel>, #tpu.dimension_semantics<parallel>, #tpu.dimension_semantics<arbitrary>], iteration_bounds = array<i64: 1, 2, 1>, scalar_prefetch = 0 : i64, scratch_operands = 1 : i64, tpu.core_type = #tpu.core_type<tc>, window_params = [{transform_indices = @transform_0, window_bounds = array<i64: 128, 256>}, {transform_indices = @transform_1, window_bounds = array<i64: 256, 512>}, {transform_indices = @transform_2, window_bounds = array<i64: 128, 512>}]} {
    %c0_i32 = arith.constant 0 : i32
    %0 = arith.cmpi eq, %arg2, %c0_i32 : i32
    %1 = arith.extui %0 : i1 to i32
    %c0_i32_0 = arith.constant 0 : i32
    %2 = arith.cmpi ne, %1, %c0_i32_0 : i32
    scf.if %2 {
      %cst_10 = arith.constant 0.000000e+00 : f32
      %12 = vector.broadcast %cst_10 : f32 to vector<128x512xf32>
      %c0_11 = arith.constant 0 : index
      %c0_12 = arith.constant 0 : index
      %13 = vector.load %arg6[%c0_11, %c0_12] : memref<128x512xf32, #tpu.memory_space<vmem>>, vector<128x512xf32>
      tpu.vector_store %arg6[%c0_11, %c0_12], %12 {strides = array<i32>} : memref<128x512xf32, #tpu.memory_space<vmem>>, vector<128x512xf32>,
    } else {
    }
    %c0 = arith.constant 0 : index
    %c0_1 = arith.constant 0 : index
    %3 = vector.load %arg6[%c0, %c0_1] : memref<128x512xf32, #tpu.memory_space<vmem>>, vector<128x512xf32>
    %c0_2 = arith.constant 0 : index
    %c0_3 = arith.constant 0 : index
    %4 = vector.load %arg3[%c0_2, %c0_3] : memref<128x256xf32, #tpu.memory_space<vmem>>, vector<128x256xf32>
    %c0_4 = arith.constant 0 : index
    %c0_5 = arith.constant 0 : index
    %5 = vector.load %arg4[%c0_4, %c0_5] : memref<256x512xf32, #tpu.memory_space<vmem>>, vector<256x512xf32>
    %cst = arith.constant dense<0.000000e+00> : vector<128x512xf32>
    %6 = tpu.matmul %4, %5, %cst {dimension_numbers = #tpu.dot_dimension_numbers<[1], [0], [0], [1], [0, 0, 1, 1], [], []>} : vector<128x256xf32>, vector<256x512xf32>, vector<128x512xf32> -> vector<128x512xf32>
    %7 = arith.addf %3, %6 : vector<128x512xf32>
    %c0_6 = arith.constant 0 : index
    %c0_7 = arith.constant 0 : index
    %8 = vector.load %arg6[%c0_6, %c0_7] : memref<128x512xf32, #tpu.memory_space<vmem>>, vector<128x512xf32>
    tpu.vector_store %arg6[%c0_6, %c0_7], %7 {strides = array<i32>} : memref<128x512xf32, #tpu.memory_space<vmem>>, vector<128x512xf32>,
    %c0_i32_8 = arith.constant 0 : i32
    %9 = arith.cmpi eq, %arg2, %c0_i32_8 : i32
    %10 = arith.extui %9 : i1 to i32
    %c0_i32_9 = arith.constant 0 : i32
    %11 = arith.cmpi ne, %10, %c0_i32_9 : i32
    scf.if %11 {
      %c0_10 = arith.constant 0 : index
      %c0_11 = arith.constant 0 : index
      %12 = vector.load %arg6[%c0_10, %c0_11] : memref<128x512xf32, #tpu.memory_space<vmem>>, vector<128x512xf32>
      %c0_12 = arith.constant 0 : index
      %c0_13 = arith.constant 0 : index
      %13 = vector.load %arg5[%c0_12, %c0_13] : memref<128x512xf32, #tpu.memory_space<vmem>>, vector<128x512xf32>
      tpu.vector_store %arg5[%c0_12, %c0_13], %12 {strides = array<i32>} : memref<128x512xf32, #tpu.memory_space<vmem>>, vector<128x512xf32>,
    } else {
    }
    return
  }
  func.func @transform_0(%arg0: i32, %arg1: i32, %arg2: i32) -> (i32, i32) {
    %c0_i32 = arith.constant 0 : i32
    return %arg0, %arg2 : i32, i32
  }
  func.func @transform_1(%arg0: i32, %arg1: i32, %arg2: i32) -> (i32, i32) {
    %c0_i32 = arith.constant 0 : i32
    return %arg2, %arg1 : i32, i32
  }
  func.func @transform_2(%arg0: i32, %arg1: i32, %arg2: i32) -> (i32, i32) {
    %c0_i32 = arith.constant 0 : i32
    return %arg0, %arg1 : i32, i32
  }
}

</mosaic_0001>

<bundles_post_ra>
// kernel: tpu_custom_call.1
= control target key start
LH: loop header
LB: loop body
LE: loop exit
PB: predicated region body
PF: predicated region fallthrough
CT: control target
= control target key end

     0   :  { %7 = vsyncpa [#allocation4], 0  ;;  %s2234_s0 = inlined_call_operand.hbm [shape: f32[128,256], index: 0, kind: input, shape index: {}]   ;;  %s2235_s1 = inlined_call_operand.hbm [shape: f32[256,1024], index: 1, kind: input, shape index: {}]   ;;  %s2236_s2 = inlined_call_operand.hbm [shape: f32[128,1024], index: 2, kind: output, shape index: {}]  }
   0x1   :  { %8 = vsyncpa [#allocation7], 0 }
   0x2   :  { %10 = vsyncpa [#allocation7 + $0x1], 0 }
   0x3   :  { %11 = vsyncpa [#allocation5], 0 }
   0x4   :  { %13 = vsyncpa [#allocation5 + $0x1], 0  ;;  %s1695_s9 = smov 0   ;;  %s1697_s10 = smov 0  }
   0x5   :  { %s1699_s11 = smov 0   ;;  %s1701_s12 = smov 0  }
   0x6   :  { %s1703_s13 = smov 0   ;;  %s1705_s14 = smov 0  }
   0x7 LB: > { %s1423_s15 = sadd.s32 4294967295, %s1669_s14   ;;  %s1424_s16 = sadd.s32 4294967294, %s1669_s14   ;;  %s1669_s14 = sphi %s1705_s14, %s19_s14   ;;  %s1665_s13 = sphi %s1703_s13, %s2248_s13   ;;  %s1661_s12 = sphi %s1701_s12, %s2247_s12   ;;  %s1657_s11 = sphi %s1699_s11, %s2246_s11   ;;  %s1653_s10 = sphi %s1697_s10, %s2245_s10   ;;  %s1649_s9 = sphi %s1695_s9, %s2244_s9  }
   0x8   : > { %p88_p0 = scmp.ne.s32.totalorder %s1653_s10, %s1649_s9  ;;  %p1729_p1 = scmp.eq.s32.totalorder %s1423_s15, 0 }
   0x9   : > { %p1733_p2 = scmp.eq.s32.totalorder %s1423_s15, 1  ;;  %p120_p3 = scmp.eq.s32.totalorder %s1424_s16, 1 }
   0xa   : > { %p1739_p4 = por %p1729_p1, %p88_p0  ;;  %p1425_p5 = scmp.ge.s32.totalorder %s1669_s14, 1 }
   0xb   : > { %p1744_p6 = por %p120_p3, %p88_p0  ;;  %p127_p7 = scmp.lt.s32.totalorder %s1669_s14, 3 }
   0xc   : > { %s144_s23 = sshll.u32 %s2234_s0, 4  ;;  %s1671_s25 = smov [#allocation3]   ;;  %s145_s23 = int_to_ptr.hbm [resolvable:$true] %s144_s23 }
   0xd   : > { %p1752_p8 = pnand %p1425_p5, %p127_p7  ;;  %s146_s26 = sshll.u32 %s1671_s25, 4  ;;  %s147_s26 = int_to_ptr.vmem [resolvable:$true] %s146_s26 }
   0xe   : > { %p1427_p11 = scmp.ge.s32.totalorder %s1669_s14, 2  ;;  %s1672_s27 = smov 256  }
   0xf   : > { %p1450_p9 = pneg %p1752_p8  ;;  %s1673_s28 = smov 16  }
  0x10   : > { %s34_s29 = sadd.s32 1, %s1665_s13  ;;  %s75_s30 = sadd.s32 1, %s1657_s11 }
  0x11   : > { %p1451_p10 = pnand %p1450_p9, %p1729_p1  ;;  %p36_p12 = scmp.ge.s32.totalorder %s34_s29, 2 }
  0x12   : > { %p82_p13 = scmp.ne.s32.totalorder %s1657_s11, %s1653_s10  ;;  %p83_p0 = scmp.eq.s32.totalorder %s1669_s14, 0 }
  0x13   : > { %1453 = dma.hbm_to_vmem [thread:$0]  (!%p1451_p10), %s145_s23, 4096, %s147_s26, [#allocation4], %s1672_s27, %s1672_s27, %s1673_s28  }
  0x14   : > { %s2250_s29 = smov (%p36_p12, %s34_s29), 0  ;;  %p1768_p3 = por %p83_p0, %p82_p13 }
  0x15   : > { %p1774_p5 = por %p1733_p2, %p82_p13  ;;  %s71_s5 = ssub.s32 %s1665_s13, %s2250_s29 }
  0x16   : > { %p1463_p7 = scmp.lt.s32.totalorder %s1669_s14, 2  ;;  %p73_p9 = scmp.eq.s32.totalorder %s71_s5, 0 }
  0x17   : > { %s160_s6 = sand.u32 1, %s1657_s11   ;;  %s1440_s15 = sshll.u32 %s1665_s13, 5 }
  0x18   : > { %s1428_s7 = sshll.u32 %s160_s6, 10  ;;  %s172_s22 = scalar_lea.hbm %s2235_s1, %s1440_s15 }
  0x19   : > { %s1783_s8 = scalar_select %p73_p9, %s1657_s11, %s75_s30  }
  0x1a   : > { %s164_s23 = scalar_lea.vmem [#allocation6], %s1428_s7  ;;  %s173_s18 = sshll.u32 %s172_s22, 4  ;;  %s174_s18 = int_to_ptr.hbm [resolvable:$true] %s173_s18 }
  0x1b   : > { %s175_s25 = sshll.u32 %s164_s23, 4  ;;  %p1455_p2 = pnand %p1463_p7, %p1768_p3  ;;  %s176_s25 = int_to_ptr.vmem [resolvable:$true] %s175_s25 }
  0x1c   : > { %s161_s26 = scalar_lea.sflag [#allocation7], %s160_s6  ;;  %s1674_s27 = smov 1024  }
  0x1d   : > { %s1675_s28 = smov 512   ;;  %s1676_s5 = smov 32  }
  0x1e   : > { %1457 = dma.hbm_to_vmem [thread:$0]  (!%p1455_p2), %s174_s18, 16384, %s176_s25, %s161_s26, %s1674_s27, %s1675_s28, %s1676_s5  }
  0x1f   : > { %187 = sbr.rel (%p1752_p8) target bundleno = 461 (0x1cd), region = 28 }
  0x24   : > { %1636 = dma.done.wait (%p1729_p1), [#allocation4], 4096  }
  0x25   : > { %1638 = vsyncadd (%p1729_p1), [#allocation4], 4294963200  ;;  %s1798_s30 = sand.u32 1, %s1653_s10  }
  0x26   : > { %s1433_s3 = sshll.u32 %s1798_s30, 10  ;;  %s195_s6 = scalar_lea.sflag [#allocation7], %s1798_s30 }
  0x27   : > { %s1802_s7 = scalar_lea.vmem [#allocation6], %s1433_s3 }
  0x28   : > { %1640 = dma.done.wait (%p1739_p4), %s195_s6, 16384  }
  0x29   : > { %1642 = vsyncadd (%p1739_p4), %s195_s6, 4294950912  ;;  %v451_v0 = vld [vmem:[%s1802_s7 + $0x1e8] sm:$0xff]  ;;  %v450_v6 = vld [vmem:[%s1802_s7 + $0x1e0] sm:$0xff]  ;;  %s1434_s17 = sshll.u32 %s1798_s30, 9  ;;  %s1441_s24 = sshll.u32 %s1661_s12, 5 }
  0x2a   : > { %v515_v1 = vld [vmem:[%s1802_s7 + $0x3e8] sm:$0xff]  ;;  %648 = vmatpush.msra.mxu2 %v451_v0  ;;  %v514_v7 = vld [vmem:[%s1802_s7 + $0x3e0] sm:$0xff]  ;;  %518 = vmatpush.msra.mxu0 %v450_v6  ;;  %v453_v62 = vld [vmem:[%s1802_s7 + $0x1f8] sm:$0xff]  ;;  %s2067_s19 = scalar_lea.vmem [#allocation8], %s1434_s17  ;;  %s1312_s21 = scalar_lea.hbm %s2236_s2, %s1441_s24 }
  0x2b   : > { %v447_v2 = vld [vmem:[%s1802_s7 + $0x1c8] sm:$0xff]  ;;  %713 = vmatpush.msra.mxu3 %v515_v1  ;;  %v446_v8 = vld [vmem:[%s1802_s7 + $0x1c0] sm:$0xff]  ;;  %583 = vmatpush.msra.mxu1 %v514_v7  ;;  %v517_v63 = vld [vmem:[%s1802_s7 + $0x3f8] sm:$0xff]  ;;  %s1313_s22 = sshll.u32 %s2067_s19, 4  ;;  %s1315_s23 = sshll.u32 %s1312_s21, 4  ;;  %s1314_s22 = int_to_ptr.vmem [resolvable:$true] %s1313_s22  ;;  %s1316_s23 = int_to_ptr.hbm [resolvable:$true] %s1315_s23 }
  0x2c   : > { %v511_v3 = vld [vmem:[%s1802_s7 + $0x3c8] sm:$0xff]  ;;  %649 = vmatpush.msra.mxu2 %v447_v2  ;;  %v510_v9 = vld [vmem:[%s1802_s7 + $0x3c0] sm:$0xff]  ;;  %519 = vmatpush.msra.mxu0 %v446_v8  ;;  %v449_v2 = vld [vmem:[%s1802_s7 + $0x1d8] sm:$0xff]  ;;  %s1298_s12 = scalar_lea.sflag [#allocation5], %s1798_s30  ;;  %s1597_s25 = sshra.s32 %s1316_s23, 4  ;;  %s1598_s25 = int_to_ptr.hbm [resolvable:$true] %s1597_s25 }
  0x2d   : > { %v443_v4 = vld [vmem:[%s1802_s7 + $0x1a8] sm:$0xff]  ;;  %714 = vmatpush.msra.mxu3 %v511_v3  ;;  %v442_v12 = vld [vmem:[%s1802_s7 + $0x1a0] sm:$0xff]  ;;  %584 = vmatpush.msra.mxu1 %v510_v9  ;;  %v513_v3 = vld [vmem:[%s1802_s7 + $0x3d8] sm:$0xff]  ;;  %s1599_s18 = scalar_lea.hbm %s1598_s25, 512  ;;  %s1603_s28 = scalar_lea.hbm %s2236_s2, 1024 }
  0x2e   : > { %v507_v5 = vld [vmem:[%s1802_s7 + $0x3a8] sm:$0xff]  ;;  %650 = vmatpush.msra.mxu2 %v443_v4  ;;  %v506_v13 = vld [vmem:[%s1802_s7 + $0x3a0] sm:$0xff]  ;;  %520 = vmatpush.msra.mxu0 %v442_v12  ;;  %v452_v6 = vld [vmem:[%s1802_s7 + $0x1f0] sm:$0xff]  ;;  %p1600_p1 = scmp.ne.s32.totalorder %s1598_s25, %s1599_s18  ;;  %p1604_p10 = scmp.lt.s32.totalorder %s1598_s25, %s2236_s2 }
  0x2f   : > { %v439_v10 = vld [vmem:[%s1802_s7 + $0x188] sm:$0xff]  ;;  %715 = vmatpush.msra.mxu3 %v507_v5  ;;  %v438_v16 = vld [vmem:[%s1802_s7 + $0x180] sm:$0xff]  ;;  %585 = vmatpush.msra.mxu1 %v506_v13  ;;  %v516_v7 = vld [vmem:[%s1802_s7 + $0x3f0] sm:$0xff]  ;;  %p1605_p12 = scmp.lt.s32.totalorder %s1603_s28, %s1599_s18 }
  0x30   : > { %v503_v11 = vld [vmem:[%s1802_s7 + $0x388] sm:$0xff]  ;;  %651 = vmatpush.msra.mxu2 %v439_v10  ;;  %v502_v17 = vld [vmem:[%s1802_s7 + $0x380] sm:$0xff]  ;;  %521 = vmatpush.msra.mxu0 %v438_v16  ;;  %v445_v8 = vld [vmem:[%s1802_s7 + $0x1b8] sm:$0xff]  ;;  %p1601_p4 = pnand %p1600_p1, %p1774_p5 }
  0x31   : > { %v435_v14 = vld [vmem:[%s1802_s7 + $0x168] sm:$0xff]  ;;  %716 = vmatpush.msra.mxu3 %v503_v11  ;;  %v434_v20 = vld [vmem:[%s1802_s7 + $0x160] sm:$0xff]  ;;  %586 = vmatpush.msra.mxu1 %v502_v17  ;;  %v509_v9 = vld [vmem:[%s1802_s7 + $0x3b8] sm:$0xff]  ;;  %p1606_p13 = por %p1605_p12, %p1604_p10 }
  0x32   : > { %v499_v15 = vld [vmem:[%s1802_s7 + $0x368] sm:$0xff]  ;;  %652 = vmatpush.msra.mxu2 %v435_v14  ;;  %v498_v21 = vld [vmem:[%s1802_s7 + $0x360] sm:$0xff]  ;;  %522 = vmatpush.msra.mxu0 %v434_v20  ;;  %v1888_v10 = vld [vmem:[#allocation3 + $0x10] sm:$0xff]  ;;  %p1602_p8 = pneg %p1601_p4 }
  0x33   : > { %v431_v18 = vld [vmem:[%s1802_s7 + $0x148] sm:$0xff]  ;;  %717 = vmatpush.msra.mxu3 %v499_v15  ;;  %v430_v24 = vld [vmem:[%s1802_s7 + $0x140] sm:$0xff]  ;;  %587 = vmatpush.msra.mxu1 %v498_v21  ;;  %v1890_v11 = vld [vmem:[#allocation3 + $0x18] sm:$0xff] }
  0x34   : > { %v495_v19 = vld [vmem:[%s1802_s7 + $0x348] sm:$0xff]  ;;  %653 = vmatpush.msra.mxu2 %v431_v18  ;;  %v494_v25 = vld [vmem:[%s1802_s7 + $0x340] sm:$0xff]  ;;  %523 = vmatpush.msra.mxu0 %v430_v24  ;;  %v448_v12 = vld [vmem:[%s1802_s7 + $0x1d0] sm:$0xff]  ;;  %p1607_p0 = pnand %p1606_p13, %p1602_p8 }
  0x35   : > { %v427_v22 = vld [vmem:[%s1802_s7 + $0x128] sm:$0xff]  ;;  %718 = vmatpush.msra.mxu3 %v495_v19  ;;  %v426_v28 = vld [vmem:[%s1802_s7 + $0x120] sm:$0xff]  ;;  %588 = vmatpush.msra.mxu1 %v494_v25  ;;  %v512_v13 = vld [vmem:[%s1802_s7 + $0x3d0] sm:$0xff] }
  0x36   : > { %v491_v23 = vld [vmem:[%s1802_s7 + $0x328] sm:$0xff]  ;;  %654 = vmatpush.msra.mxu2 %v427_v22  ;;  %v490_v29 = vld [vmem:[%s1802_s7 + $0x320] sm:$0xff]  ;;  %524 = vmatpush.msra.mxu0 %v426_v28  ;;  %v441_v14 = vld [vmem:[%s1802_s7 + $0x198] sm:$0xff] }
  0x37   : > { %v423_v26 = vld [vmem:[%s1802_s7 + $0x108] sm:$0xff]  ;;  %719 = vmatpush.msra.mxu3 %v491_v23  ;;  %v422_v32 = vld [vmem:[%s1802_s7 + $0x100] sm:$0xff]  ;;  %589 = vmatpush.msra.mxu1 %v490_v29  ;;  %v505_v15 = vld [vmem:[%s1802_s7 + $0x398] sm:$0xff] }
  0x38   : > { %v487_v27 = vld [vmem:[%s1802_s7 + $0x308] sm:$0xff]  ;;  %655 = vmatpush.msra.mxu2 %v423_v26  ;;  %v486_v33 = vld [vmem:[%s1802_s7 + $0x300] sm:$0xff]  ;;  %525 = vmatpush.msra.mxu0 %v422_v32  ;;  %v444_v16 = vld [vmem:[%s1802_s7 + $0x1b0] sm:$0xff] }
  0x39   : > { %v419_v30 = vld [vmem:[%s1802_s7 + $0xe8] sm:$0xff]  ;;  %720 = vmatpush.msra.mxu3 %v487_v27  ;;  %v418_v36 = vld [vmem:[%s1802_s7 + $0xe0] sm:$0xff]  ;;  %590 = vmatpush.msra.mxu1 %v486_v33  ;;  %v508_v17 = vld [vmem:[%s1802_s7 + $0x3b0] sm:$0xff] }
  0x3a   : > { %v483_v31 = vld [vmem:[%s1802_s7 + $0x2e8] sm:$0xff]  ;;  %656 = vmatpush.msra.mxu2 %v419_v30  ;;  %v482_v37 = vld [vmem:[%s1802_s7 + $0x2e0] sm:$0xff]  ;;  %526 = vmatpush.msra.mxu0 %v418_v36  ;;  %v437_v18 = vld [vmem:[%s1802_s7 + $0x178] sm:$0xff] }
  0x3b   : > { %v415_v34 = vld [vmem:[%s1802_s7 + $0xc8] sm:$0xff]  ;;  %721 = vmatpush.msra.mxu3 %v483_v31  ;;  %v414_v40 = vld [vmem:[%s1802_s7 + $0xc0] sm:$0xff]  ;;  %591 = vmatpush.msra.mxu1 %v482_v37  ;;  %v501_v19 = vld [vmem:[%s1802_s7 + $0x378] sm:$0xff] }
  0x3c   : > { %v479_v35 = vld [vmem:[%s1802_s7 + $0x2c8] sm:$0xff]  ;;  %657 = vmatpush.msra.mxu2 %v415_v34  ;;  %v478_v41 = vld [vmem:[%s1802_s7 + $0x2c0] sm:$0xff]  ;;  %527 = vmatpush.msra.mxu0 %v414_v40  ;;  %v440_v20 = vld [vmem:[%s1802_s7 + $0x190] sm:$0xff] }
  0x3d   : > { %v411_v38 = vld [vmem:[%s1802_s7 + $0xa8] sm:$0xff]  ;;  %722 = vmatpush.msra.mxu3 %v479_v35  ;;  %v410_v44 = vld [vmem:[%s1802_s7 + $0xa0] sm:$0xff]  ;;  %592 = vmatpush.msra.mxu1 %v478_v41  ;;  %v504_v21 = vld [vmem:[%s1802_s7 + $0x390] sm:$0xff] }
  0x3e   : > { %v475_v39 = vld [vmem:[%s1802_s7 + $0x2a8] sm:$0xff]  ;;  %658 = vmatpush.msra.mxu2 %v411_v38  ;;  %v474_v45 = vld [vmem:[%s1802_s7 + $0x2a0] sm:$0xff]  ;;  %528 = vmatpush.msra.mxu0 %v410_v44  ;;  %v433_v22 = vld [vmem:[%s1802_s7 + $0x158] sm:$0xff] }
  0x3f   : > { %v407_v42 = vld [vmem:[%s1802_s7 + $0x88] sm:$0xff]  ;;  %723 = vmatpush.msra.mxu3 %v475_v39  ;;  %v406_v48 = vld [vmem:[%s1802_s7 + $0x80] sm:$0xff]  ;;  %593 = vmatpush.msra.mxu1 %v474_v45  ;;  %v497_v23 = vld [vmem:[%s1802_s7 + $0x358] sm:$0xff] }
  0x40   : > { %v471_v43 = vld [vmem:[%s1802_s7 + $0x288] sm:$0xff]  ;;  %659 = vmatpush.msra.mxu2 %v407_v42  ;;  %v470_v49 = vld [vmem:[%s1802_s7 + $0x280] sm:$0xff]  ;;  %529 = vmatpush.msra.mxu0 %v406_v48  ;;  %v436_v26 = vld [vmem:[%s1802_s7 + $0x170] sm:$0xff] }
  0x41   : > { %v403_v46 = vld [vmem:[%s1802_s7 + $0x68] sm:$0xff]  ;;  %724 = vmatpush.msra.mxu3 %v471_v43  ;;  %v402_v52 = vld [vmem:[%s1802_s7 + $0x60] sm:$0xff]  ;;  %594 = vmatpush.msra.mxu1 %v470_v49  ;;  %v500_v27 = vld [vmem:[%s1802_s7 + $0x370] sm:$0xff] }
  0x42   : > { %v467_v47 = vld [vmem:[%s1802_s7 + $0x268] sm:$0xff]  ;;  %660 = vmatpush.msra.mxu2 %v403_v46  ;;  %v466_v53 = vld [vmem:[%s1802_s7 + $0x260] sm:$0xff]  ;;  %530 = vmatpush.msra.mxu0 %v402_v52  ;;  %v432_v28 = vld [vmem:[%s1802_s7 + $0x150] sm:$0xff] }
  0x43   : > { %v399_v50 = vld [vmem:[%s1802_s7 + $0x48] sm:$0xff]  ;;  %725 = vmatpush.msra.mxu3 %v467_v47  ;;  %v398_v56 = vld [vmem:[%s1802_s7 + $0x40] sm:$0xff]  ;;  %595 = vmatpush.msra.mxu1 %v466_v53  ;;  %v496_v29 = vld [vmem:[%s1802_s7 + $0x350] sm:$0xff] }
  0x44   : > { %v463_v51 = vld [vmem:[%s1802_s7 + $0x248] sm:$0xff]  ;;  %661 = vmatpush.msra.mxu2 %v399_v50  ;;  %v462_v57 = vld [vmem:[%s1802_s7 + $0x240] sm:$0xff]  ;;  %531 = vmatpush.msra.mxu0 %v398_v56  ;;  %v429_v30 = vld [vmem:[%s1802_s7 + $0x138] sm:$0xff] }
  0x45   : > { %v395_v54 = vld [vmem:[%s1802_s7 + $0x28] sm:$0xff]  ;;  %726 = vmatpush.msra.mxu3 %v463_v51  ;;  %v1868_v60 = vld [vmem:[#allocation3] sm:$0xff]  ;;  %596 = vmatpush.msra.mxu1 %v462_v57  ;;  %v493_v31 = vld [vmem:[%s1802_s7 + $0x338] sm:$0xff] }
  0x46   : > { %v459_v55 = vld [vmem:[%s1802_s7 + $0x228] sm:$0xff]  ;;  %662 = vmatpush.msra.mxu2 %v395_v54  ;;  %v394_v0 = vld [vmem:[%s1802_s7 + $0x20] sm:$0xff]  ;;  %v1920_v32 = vld [vmem:[#allocation3 + $0x30] sm:$0xff] }
  0x47   : > { %v391_v58 = vld [vmem:[%s1802_s7 + $0x8] sm:$0xff]  ;;  %727 = vmatpush.msra.mxu3 %v459_v55  ;;  %v458_v1 = vld [vmem:[%s1802_s7 + $0x220] sm:$0xff]  ;;  %532 = vmatpush.msra.mxu0 %v394_v0  ;;  %v1924_v33 = vld [vmem:[#allocation3 + $0x38] sm:$0xff] }
  0x48   : > { %v455_v59 = vld [vmem:[%s1802_s7 + $0x208] sm:$0xff]  ;;  %663 = vmatpush.msra.mxu2 %v391_v58  ;;  %v390_v4 = vld [vmem:[%s1802_s7] sm:$0xff]  ;;  %597 = vmatpush.msra.mxu1 %v458_v1  ;;  %v428_v34 = vld [vmem:[%s1802_s7 + $0x130] sm:$0xff] }
  0x49   : > { %v1870_v61 = vld [vmem:[#allocation3 + $0x8] sm:$0xff]  ;;  %728 = vmatpush.msra.mxu3 %v455_v59  ;;  %664 = vmatmul.f32.vlgmr.msra.gmra.mxu2 %v1868_v60  ;;  %v454_v5 = vld [vmem:[%s1802_s7 + $0x200] sm:$0xff]  ;;  %v492_v35 = vld [vmem:[%s1802_s7 + $0x330] sm:$0xff] }
  0x4a   : > { %729 = vmatmul.f32.vlgmr.msra.gmra.mxu3 %v1870_v61  ;;  %908 = vmatpush.msrb.mxu2 %v453_v62  ;;  %v1908_v24 = vld [vmem:[#allocation3 + $0x20] sm:$0xff]  ;;  %v1910_v25 = vld [vmem:[#allocation3 + $0x28] sm:$0xff]  ;;  %v425_v36 = vld [vmem:[%s1802_s7 + $0x118] sm:$0xff] }
  0x4b   : > { %973 = vmatpush.msrb.mxu3 %v517_v63  ;;  %533 = vmatpush.msra.mxu0 %v390_v4  ;;  %v489_v37 = vld [vmem:[%s1802_s7 + $0x318] sm:$0xff]  ;;  %v1932_v38 = vld [vmem:[#allocation3 + $0x40] sm:$0xff]  ;;  %v1936_v39 = vld [vmem:[#allocation3 + $0x48] sm:$0xff] }
  0x4c   : > { %909 = vmatpush.msrb.mxu2 %v449_v2  ;;  %598 = vmatpush.msra.mxu1 %v454_v5  ;;  %v424_v40 = vld [vmem:[%s1802_s7 + $0x110] sm:$0xff]  ;;  %v421_v42 = vld [vmem:[%s1802_s7 + $0xf8] sm:$0xff]  ;;  %v1956_v50 = vld [vmem:[#allocation3 + $0x60] sm:$0xff] }
  0x4d   : > { %974 = vmatpush.msrb.mxu3 %v513_v3  ;;  %534 = vmatmul.f32.vlgmr.msra.gmra.mxu0 %v1868_v60  ;;  %v488_v41 = vld [vmem:[%s1802_s7 + $0x310] sm:$0xff]  ;;  %v485_v43 = vld [vmem:[%s1802_s7 + $0x2f8] sm:$0xff]  ;;  %v1960_v51 = vld [vmem:[#allocation3 + $0x68] sm:$0xff] }
  0x4e   : > { %599 = vmatmul.f32.vlgmr.msra.gmra.mxu1 %v1870_v61  ;;  %778 = vmatpush.msrb.mxu0 %v452_v6  ;;  %v1944_v44 = vld [vmem:[#allocation3 + $0x50] sm:$0xff]  ;;  %v1948_v45 = vld [vmem:[#allocation3 + $0x58] sm:$0xff]  ;;  %v1980_v0 = vld [vmem:[#allocation3 + $0x80] sm:$0xff] }
  0x4f   : > { %843 = vmatpush.msrb.mxu1 %v516_v7  ;;  %910 = vmatpush.msrb.mxu2 %v445_v8  ;;  %v420_v46 = vld [vmem:[%s1802_s7 + $0xf0] sm:$0xff]  ;;  %v417_v48 = vld [vmem:[%s1802_s7 + $0xd8] sm:$0xff]  ;;  %v1984_v1 = vld [vmem:[#allocation3 + $0x88] sm:$0xff] }
  0x50   : > { %975 = vmatpush.msrb.mxu3 %v509_v9  ;;  %779 = vmatpush.msrb.mxu0 %v448_v12  ;;  %v484_v47 = vld [vmem:[%s1802_s7 + $0x2f0] sm:$0xff]  ;;  %v481_v49 = vld [vmem:[%s1802_s7 + $0x2d8] sm:$0xff] }
  0x51   : > { %667 = vmatmul.f32.gmra.mxu2 %v1888_v10  ;;  %844 = vmatpush.msrb.mxu1 %v512_v13  ;;  %v416_v52 = vld [vmem:[%s1802_s7 + $0xd0] sm:$0xff]  ;;  %v413_v54 = vld [vmem:[%s1802_s7 + $0xb8] sm:$0xff] }
  0x52   : > { %732 = vmatmul.f32.gmra.mxu3 %v1890_v11  ;;  %911 = vmatpush.msrb.mxu2 %v441_v14  ;;  %v480_v53 = vld [vmem:[%s1802_s7 + $0x2d0] sm:$0xff]  ;;  %v477_v55 = vld [vmem:[%s1802_s7 + $0x2b8] sm:$0xff]  ;;  %v2004_v14 = vld [vmem:[#allocation3 + $0xa0] sm:$0xff] }
  0x53   : > { %976 = vmatpush.msrb.mxu3 %v505_v15  ;;  %780 = vmatpush.msrb.mxu0 %v444_v16  ;;  %v1968_v56 = vld [vmem:[#allocation3 + $0x70] sm:$0xff]  ;;  %v1972_v57 = vld [vmem:[#allocation3 + $0x78] sm:$0xff]  ;;  %v2008_v15 = vld [vmem:[#allocation3 + $0xa8] sm:$0xff] }
  0x54   : > { %845 = vmatpush.msrb.mxu1 %v508_v17  ;;  %912 = vmatpush.msrb.mxu2 %v437_v18  ;;  %v412_v58 = vld [vmem:[%s1802_s7 + $0xb0] sm:$0xff]  ;;  %v409_v62 = vld [vmem:[%s1802_s7 + $0x98] sm:$0xff] }
  0x55   : > { %977 = vmatpush.msrb.mxu3 %v501_v19  ;;  %537 = vmatmul.f32.gmra.mxu0 %v1888_v10  ;;  %v476_v59 = vld [vmem:[%s1802_s7 + $0x2b0] sm:$0xff]  ;;  %v473_v63 = vld [vmem:[%s1802_s7 + $0x298] sm:$0xff] }
  0x56   : > { %602 = vmatmul.f32.gmra.mxu1 %v1890_v11  ;;  %781 = vmatpush.msrb.mxu0 %v440_v20  ;;  %v408_v2 = vld [vmem:[%s1802_s7 + $0x90] sm:$0xff]  ;;  %v405_v4 = vld [vmem:[%s1802_s7 + $0x78] sm:$0xff] }
  0x57   : > { %846 = vmatpush.msrb.mxu1 %v504_v21  ;;  %913 = vmatpush.msrb.mxu2 %v433_v22  ;;  %v472_v3 = vld [vmem:[%s1802_s7 + $0x290] sm:$0xff]  ;;  %v469_v5 = vld [vmem:[%s1802_s7 + $0x278] sm:$0xff] }
  0x58   : > { %978 = vmatpush.msrb.mxu3 %v497_v23  ;;  %782 = vmatpush.msrb.mxu0 %v436_v26  ;;  %v1992_v6 = vld [vmem:[#allocation3 + $0x90] sm:$0xff]  ;;  %v1996_v7 = vld [vmem:[#allocation3 + $0x98] sm:$0xff] }
  0x59   : > { %670 = vmatmul.f32.gmra.mxu2 %v1908_v24  ;;  %847 = vmatpush.msrb.mxu1 %v500_v27  ;;  %v404_v8 = vld [vmem:[%s1802_s7 + $0x70] sm:$0xff]  ;;  %v401_v12 = vld [vmem:[%s1802_s7 + $0x58] sm:$0xff] }
  0x5a   : > { %735 = vmatmul.f32.gmra.mxu3 %v1910_v25  ;;  %914 = vmatpush.msrb.mxu2 %v429_v30  ;;  %v468_v9 = vld [vmem:[%s1802_s7 + $0x270] sm:$0xff]  ;;  %v465_v13 = vld [vmem:[%s1802_s7 + $0x258] sm:$0xff] }
  0x5b   : > { %979 = vmatpush.msrb.mxu3 %v493_v31  ;;  %783 = vmatpush.msrb.mxu0 %v432_v28  ;;  %v400_v16 = vld [vmem:[%s1802_s7 + $0x50] sm:$0xff]  ;;  %v397_v18 = vld [vmem:[%s1802_s7 + $0x38] sm:$0xff]  ;;  %v2028_v28 = vld [vmem:[#allocation3 + $0xc0] sm:$0xff] }
  0x5c   : > { %848 = vmatpush.msrb.mxu1 %v496_v29  ;;  %915 = vmatpush.msrb.mxu2 %v425_v36  ;;  %v464_v17 = vld [vmem:[%s1802_s7 + $0x250] sm:$0xff]  ;;  %v461_v19 = vld [vmem:[%s1802_s7 + $0x238] sm:$0xff]  ;;  %v2032_v29 = vld [vmem:[#allocation3 + $0xc8] sm:$0xff] }
  0x5d   : > { %540 = vmatmul.f32.gmra.mxu0 %v1908_v24  ;;  %980 = vmatpush.msrb.mxu3 %v489_v37  ;;  %v2016_v20 = vld [vmem:[#allocation3 + $0xb0] sm:$0xff]  ;;  %v2020_v21 = vld [vmem:[#allocation3 + $0xb8] sm:$0xff]  ;;  %v2048_v36 = vld [vmem:[#allocation3 + $0xe0] sm:$0xff] }
  0x5e   : > { %605 = vmatmul.f32.gmra.mxu1 %v1910_v25  ;;  %784 = vmatpush.msrb.mxu0 %v428_v34  ;;  %v396_v22 = vld [vmem:[%s1802_s7 + $0x30] sm:$0xff]  ;;  %v393_v26 = vld [vmem:[%s1802_s7 + $0x18] sm:$0xff]  ;;  %v2050_v37 = vld [vmem:[#allocation3 + $0xe8] sm:$0xff] }
  0x5f   : > { %849 = vmatpush.msrb.mxu1 %v492_v35  ;;  %916 = vmatpush.msrb.mxu2 %v421_v42  ;;  %v460_v23 = vld [vmem:[%s1802_s7 + $0x230] sm:$0xff]  ;;  %v457_v27 = vld [vmem:[%s1802_s7 + $0x218] sm:$0xff] }
  0x60   : > { %785 = vmatpush.msrb.mxu0 %v424_v40  ;;  %981 = vmatpush.msrb.mxu3 %v485_v43  ;;  %v392_v30 = vld [vmem:[%s1802_s7 + $0x10] sm:$0xff]  ;;  %v2042_v35 = vld [vmem:[#allocation3 + $0xd8] sm:$0xff] }
  0x61   : > { %673 = vmatmul.f32.gmra.mxu2 %v1920_v32  ;;  %850 = vmatpush.msrb.mxu1 %v488_v41  ;;  %v456_v31 = vld [vmem:[%s1802_s7 + $0x210] sm:$0xff]  ;;  %v2058_v41 = vld [vmem:[#allocation3 + $0xf8] sm:$0xff] }
  0x62   : > { %738 = vmatmul.f32.gmra.mxu3 %v1924_v33  ;;  %786 = vmatpush.msrb.mxu0 %v420_v46  ;;  %v2040_v34 = vld [vmem:[#allocation3 + $0xd0] sm:$0xff] }
  0x63   : > { %851 = vmatpush.msrb.mxu1 %v484_v47  ;;  %917 = vmatpush.msrb.mxu2 %v417_v48  ;;  %v2056_v40 = vld [vmem:[#allocation3 + $0xf0] sm:$0xff] }
  0x64   : > { %982 = vmatpush.msrb.mxu3 %v481_v49  ;;  %787 = vmatpush.msrb.mxu0 %v416_v52 }
  0x65   : > { %543 = vmatmul.f32.gmra.mxu0 %v1920_v32  ;;  %852 = vmatpush.msrb.mxu1 %v480_v53 }
  0x66   : > { %608 = vmatmul.f32.gmra.mxu1 %v1924_v33  ;;  %918 = vmatpush.msrb.mxu2 %v413_v54 }
  0x67   : > { %983 = vmatpush.msrb.mxu3 %v477_v55  ;;  %788 = vmatpush.msrb.mxu0 %v412_v58 }
  0x68   : > { %853 = vmatpush.msrb.mxu1 %v476_v59  ;;  %919 = vmatpush.msrb.mxu2 %v409_v62 }
  0x69   : > { %676 = vmatmul.f32.gmra.mxu2 %v1932_v38  ;;  %984 = vmatpush.msrb.mxu3 %v473_v63 }
  0x6a   : > { %741 = vmatmul.f32.gmra.mxu3 %v1936_v39  ;;  %789 = vmatpush.msrb.mxu0 %v408_v2 }
  0x6b   : > { %854 = vmatpush.msrb.mxu1 %v472_v3  ;;  %920 = vmatpush.msrb.mxu2 %v405_v4 }
  0x6c   : > { %985 = vmatpush.msrb.mxu3 %v469_v5  ;;  %790 = vmatpush.msrb.mxu0 %v404_v8 }
  0x6d   : > { %546 = vmatmul.f32.gmra.mxu0 %v1932_v38  ;;  %855 = vmatpush.msrb.mxu1 %v468_v9 }
  0x6e   : > { %611 = vmatmul.f32.gmra.mxu1 %v1936_v39  ;;  %921 = vmatpush.msrb.mxu2 %v401_v12 }
  0x6f   : > { %986 = vmatpush.msrb.mxu3 %v465_v13  ;;  %791 = vmatpush.msrb.mxu0 %v400_v16 }
  0x70   : > { %856 = vmatpush.msrb.mxu1 %v464_v17  ;;  %922 = vmatpush.msrb.mxu2 %v397_v18 }
  0x71   : > { %679 = vmatmul.f32.gmra.mxu2 %v1944_v44  ;;  %987 = vmatpush.msrb.mxu3 %v461_v19 }
  0x72   : > { %744 = vmatmul.f32.gmra.mxu3 %v1948_v45  ;;  %792 = vmatpush.msrb.mxu0 %v396_v22 }
  0x73   : > { %857 = vmatpush.msrb.mxu1 %v460_v23  ;;  %923 = vmatpush.msrb.mxu2 %v393_v26 }
  0x74   : > { %988 = vmatpush.msrb.mxu3 %v457_v27  ;;  %793 = vmatpush.msrb.mxu0 %v392_v30 }
  0x75   : > { %549 = vmatmul.f32.gmra.mxu0 %v1944_v44  ;;  %858 = vmatpush.msrb.mxu1 %v456_v31 }
  0x76   : > { %614 = vmatmul.f32.gmra.mxu1 %v1948_v45 }
  0x79   : > { %682 = vmatmul.f32.gmra.mxu2 %v1956_v50 }
  0x7a   : > { %747 = vmatmul.f32.gmra.mxu3 %v1960_v51 }
  0x7d   : > { %552 = vmatmul.f32.gmra.mxu0 %v1956_v50 }
  0x7e   : > { %617 = vmatmul.f32.gmra.mxu1 %v1960_v51 }
  0x81   : > { %685 = vmatmul.f32.gmra.mxu2 %v1968_v56 }
  0x82   : > { %750 = vmatmul.f32.gmra.mxu3 %v1972_v57 }
  0x85   : > { %555 = vmatmul.f32.gmra.mxu0 %v1968_v56 }
  0x86   : > { %620 = vmatmul.f32.gmra.mxu1 %v1972_v57 }
  0x89   : > { %688 = vmatmul.f32.gmra.mxu2 %v1980_v0 }
  0x8a   : > { %753 = vmatmul.f32.gmra.mxu3 %v1984_v1 }
  0x8d   : > { %558 = vmatmul.f32.gmra.mxu0 %v1980_v0 }
  0x8e   : > { %623 = vmatmul.f32.gmra.mxu1 %v1984_v1 }
  0x91   : > { %691 = vmatmul.f32.gmra.mxu2 %v1992_v6 }
  0x92   : > { %756 = vmatmul.f32.gmra.mxu3 %v1996_v7 }
  0x95   : > { %561 = vmatmul.f32.gmra.mxu0 %v1992_v6 }
  0x96   : > { %626 = vmatmul.f32.gmra.mxu1 %v1996_v7 }
  0x99   : > { %694 = vmatmul.f32.gmra.mxu2 %v2004_v14 }
  0x9a   : > { %759 = vmatmul.f32.gmra.mxu3 %v2008_v15 }
  0x9d   : > { %564 = vmatmul.f32.gmra.mxu0 %v2004_v14 }
  0x9e   : > { %629 = vmatmul.f32.gmra.mxu1 %v2008_v15 }
  0xa1   : > { %697 = vmatmul.f32.gmra.mxu2 %v2016_v20 }
  0xa2   : > { %762 = vmatmul.f32.gmra.mxu3 %v2020_v21 }
  0xa5   : > { %567 = vmatmul.f32.gmra.mxu0 %v2016_v20 }
  0xa6   : > { %632 = vmatmul.f32.gmra.mxu1 %v2020_v21 }
  0xa9   : > { %700 = vmatmul.f32.gmra.mxu2 %v2028_v28 }
  0xaa   : > { %765 = vmatmul.f32.gmra.mxu3 %v2032_v29 }
  0xad   : > { %570 = vmatmul.f32.gmra.mxu0 %v2028_v28 }
  0xae   : > { %635 = vmatmul.f32.gmra.mxu1 %v2032_v29 }
  0xb1   : > { %703 = vmatmul.f32.gmra.mxu2 %v2040_v34 }
  0xb2   : > { %768 = vmatmul.f32.gmra.mxu3 %v2042_v35 }
  0xb5   : > { %573 = vmatmul.f32.gmra.mxu0 %v2040_v34 }
  0xb6   : > { %638 = vmatmul.f32.gmra.mxu1 %v2042_v35 }
  0xb9   : > { %706 = vmatmul.f32.gmra.mxu2 %v2048_v36 }
  0xba   : > { %771 = vmatmul.f32.gmra.mxu3 %v2050_v37 }
  0xbd   : > { %576 = vmatmul.f32.gmra.mxu0 %v2048_v36 }
  0xbe   : > { %641 = vmatmul.f32.gmra.mxu1 %v2050_v37 }
  0xc1   : > { %709 = vmatmul.f32.gmra.mxu2 %v2056_v40 }
  0xc2   : > { %774 = vmatmul.f32.gmra.mxu3 %v2058_v41 }
  0xc5   : > { %579 = vmatmul.f32.gmra.mxu0 %v2056_v40 }
  0xc6   : > { %644 = vmatmul.f32.gmra.mxu1 %v2058_v41 }
  0xc9   : > { %924 = vmatmul.f32.vlgmr.msrb.gmra.mxu2 %v1868_v60 }
  0xca   : > { %989 = vmatmul.f32.vlgmr.msrb.gmra.mxu3 %v1870_v61  ;;  %v535_v42 = vpop.f32.mrf.mxu0 }
  0xcb   : > { %v600_v43 = vpop.f32.mrf.mxu1 }
  0xcc   : > { %v601_v46 = vadd.f32 %v600_v43, %v535_v42  ;;  %v665_v47 = vpop.f32.mrf.mxu2 }
  0xcd   : > { %v730_v48 = vpop.f32.mrf.mxu3  ;;  %794 = vmatmul.f32.vlgmr.msrb.gmra.mxu0 %v1868_v60 }
  0xce   : > { %v731_v49 = vadd.f32 %v730_v48, %v665_v47  ;;  %1233 = vst [vmem:[%s2067_s19] sm:$0xff] %v601_v46  ;;  %859 = vmatmul.f32.vlgmr.msrb.gmra.mxu1 %v1870_v61 }
  0xd0   : > { %1234 = vst [vmem:[%s2067_s19 + $0x8] sm:$0xff] %v731_v49 }
  0xd1   : > { %927 = vmatmul.f32.gmra.mxu2 %v1888_v10 }
  0xd2   : > { %992 = vmatmul.f32.gmra.mxu3 %v1890_v11  ;;  %v538_v52 = vpop.f32.mrf.mxu0 }
  0xd3   : > { %v603_v53 = vpop.f32.mrf.mxu1 }
  0xd4   : > { %v604_v54 = vadd.f32 %v603_v53, %v538_v52  ;;  %v668_v55 = vpop.f32.mrf.mxu2 }
  0xd5   : > { %v733_v58 = vpop.f32.mrf.mxu3  ;;  %797 = vmatmul.f32.gmra.mxu0 %v1888_v10 }
  0xd6   : > { %v734_v59 = vadd.f32 %v733_v58, %v668_v55  ;;  %1237 = vst [vmem:[%s2067_s19 + $0x20] sm:$0xff] %v604_v54  ;;  %862 = vmatmul.f32.gmra.mxu1 %v1890_v11 }
  0xd8   : > { %1238 = vst [vmem:[%s2067_s19 + $0x28] sm:$0xff] %v734_v59 }
  0xd9   : > { %930 = vmatmul.f32.gmra.mxu2 %v1908_v24 }
  0xda   : > { %995 = vmatmul.f32.gmra.mxu3 %v1910_v25  ;;  %v541_v60 = vpop.f32.mrf.mxu0 }
  0xdb   : > { %v606_v61 = vpop.f32.mrf.mxu1 }
  0xdc   : > { %v607_v62 = vadd.f32 %v606_v61, %v541_v60  ;;  %v671_v63 = vpop.f32.mrf.mxu2 }
  0xdd   : > { %v736_v2 = vpop.f32.mrf.mxu3  ;;  %800 = vmatmul.f32.gmra.mxu0 %v1908_v24 }
  0xde   : > { %v737_v3 = vadd.f32 %v736_v2, %v671_v63  ;;  %1241 = vst [vmem:[%s2067_s19 + $0x40] sm:$0xff] %v607_v62  ;;  %865 = vmatmul.f32.gmra.mxu1 %v1910_v25 }
  0xe0   : > { %1242 = vst [vmem:[%s2067_s19 + $0x48] sm:$0xff] %v737_v3 }
  0xe1   : > { %933 = vmatmul.f32.gmra.mxu2 %v1920_v32 }
  0xe2   : > { %998 = vmatmul.f32.gmra.mxu3 %v1924_v33  ;;  %v544_v10 = vpop.f32.mrf.mxu0 }
  0xe3   : > { %v609_v11 = vpop.f32.mrf.mxu1 }
  0xe4   : > { %v610_v4 = vadd.f32 %v609_v11, %v544_v10  ;;  %v674_v5 = vpop.f32.mrf.mxu2 }
  0xe5   : > { %v739_v8 = vpop.f32.mrf.mxu3  ;;  %803 = vmatmul.f32.gmra.mxu0 %v1920_v32 }
  0xe6   : > { %v740_v9 = vadd.f32 %v739_v8, %v674_v5  ;;  %1245 = vst [vmem:[%s2067_s19 + $0x60] sm:$0xff] %v610_v4  ;;  %868 = vmatmul.f32.gmra.mxu1 %v1924_v33 }
  0xe8   : > { %1246 = vst [vmem:[%s2067_s19 + $0x68] sm:$0xff] %v740_v9 }
  0xe9   : > { %936 = vmatmul.f32.gmra.mxu2 %v1932_v38 }
  0xea   : > { %1001 = vmatmul.f32.gmra.mxu3 %v1936_v39  ;;  %v547_v24 = vpop.f32.mrf.mxu0 }
  0xeb   : > { %v612_v25 = vpop.f32.mrf.mxu1 }
  0xec   : > { %v613_v12 = vadd.f32 %v612_v25, %v547_v24  ;;  %v677_v13 = vpop.f32.mrf.mxu2 }
  0xed   : > { %v742_v16 = vpop.f32.mrf.mxu3  ;;  %806 = vmatmul.f32.gmra.mxu0 %v1932_v38 }
  0xee   : > { %v743_v17 = vadd.f32 %v742_v16, %v677_v13  ;;  %1249 = vst [vmem:[%s2067_s19 + $0x80] sm:$0xff] %v613_v12  ;;  %871 = vmatmul.f32.gmra.mxu1 %v1936_v39 }
  0xf0   : > { %1250 = vst [vmem:[%s2067_s19 + $0x88] sm:$0xff] %v743_v17 }
  0xf1   : > { %939 = vmatmul.f32.gmra.mxu2 %v1944_v44 }
  0xf2   : > { %1004 = vmatmul.f32.gmra.mxu3 %v1948_v45  ;;  %v550_v32 = vpop.f32.mrf.mxu0 }
  0xf3   : > { %v615_v33 = vpop.f32.mrf.mxu1 }
  0xf4   : > { %v616_v18 = vadd.f32 %v615_v33, %v550_v32  ;;  %v680_v19 = vpop.f32.mrf.mxu2 }
  0xf5   : > { %v745_v22 = vpop.f32.mrf.mxu3  ;;  %809 = vmatmul.f32.gmra.mxu0 %v1944_v44 }
  0xf6   : > { %v746_v23 = vadd.f32 %v745_v22, %v680_v19  ;;  %1253 = vst [vmem:[%s2067_s19 + $0xa0] sm:$0xff] %v616_v18  ;;  %874 = vmatmul.f32.gmra.mxu1 %v1948_v45 }
  0xf8   : > { %1254 = vst [vmem:[%s2067_s19 + $0xa8] sm:$0xff] %v746_v23 }
  0xf9   : > { %942 = vmatmul.f32.gmra.mxu2 %v1956_v50 }
  0xfa   : > { %1007 = vmatmul.f32.gmra.mxu3 %v1960_v51  ;;  %v553_v38 = vpop.f32.mrf.mxu0 }
  0xfb   : > { %v618_v39 = vpop.f32.mrf.mxu1 }
  0xfc   : > { %v619_v26 = vadd.f32 %v618_v39, %v553_v38  ;;  %v683_v27 = vpop.f32.mrf.mxu2 }
  0xfd   : > { %v748_v30 = vpop.f32.mrf.mxu3  ;;  %812 = vmatmul.f32.gmra.mxu0 %v1956_v50 }
  0xfe   : > { %v749_v31 = vadd.f32 %v748_v30, %v683_v27  ;;  %1257 = vst [vmem:[%s2067_s19 + $0xc0] sm:$0xff] %v619_v26  ;;  %877 = vmatmul.f32.gmra.mxu1 %v1960_v51 }
 0x100   : > { %1258 = vst [vmem:[%s2067_s19 + $0xc8] sm:$0xff] %v749_v31 }
 0x101   : > { %945 = vmatmul.f32.gmra.mxu2 %v1968_v56 }
 0x102   : > { %1010 = vmatmul.f32.gmra.mxu3 %v1972_v57  ;;  %v556_v44 = vpop.f32.mrf.mxu0 }
 0x103   : > { %v621_v45 = vpop.f32.mrf.mxu1 }
 0x104   : > { %v622_v42 = vadd.f32 %v621_v45, %v556_v44  ;;  %v686_v43 = vpop.f32.mrf.mxu2 }
 0x105   : > { %v751_v46 = vpop.f32.mrf.mxu3  ;;  %815 = vmatmul.f32.gmra.mxu0 %v1968_v56 }
 0x106   : > { %v752_v47 = vadd.f32 %v751_v46, %v686_v43  ;;  %1261 = vst [vmem:[%s2067_s19 + $0xe0] sm:$0xff] %v622_v42  ;;  %880 = vmatmul.f32.gmra.mxu1 %v1972_v57 }
 0x108   : > { %1262 = vst [vmem:[%s2067_s19 + $0xe8] sm:$0xff] %v752_v47 }
 0x109   : > { %948 = vmatmul.f32.gmra.mxu2 %v1980_v0 }
 0x10a   : > { %1013 = vmatmul.f32.gmra.mxu3 %v1984_v1  ;;  %v559_v50 = vpop.f32.mrf.mxu0 }
 0x10b   : > { %v624_v51 = vpop.f32.mrf.mxu1 }
 0x10c   : > { %v625_v48 = vadd.f32 %v624_v51, %v559_v50  ;;  %v689_v49 = vpop.f32.mrf.mxu2 }
 0x10d   : > { %v754_v52 = vpop.f32.mrf.mxu3  ;;  %818 = vmatmul.f32.gmra.mxu0 %v1980_v0 }
 0x10e   : > { %v755_v53 = vadd.f32 %v754_v52, %v689_v49  ;;  %1265 = vst [vmem:[%s2067_s19 + $0x100] sm:$0xff] %v625_v48  ;;  %883 = vmatmul.f32.gmra.mxu1 %v1984_v1 }
 0x110   : > { %1266 = vst [vmem:[%s2067_s19 + $0x108] sm:$0xff] %v755_v53 }
 0x111   : > { %951 = vmatmul.f32.gmra.mxu2 %v1992_v6 }
 0x112   : > { %1016 = vmatmul.f32.gmra.mxu3 %v1996_v7  ;;  %v562_v56 = vpop.f32.mrf.mxu0 }
 0x113   : > { %v627_v57 = vpop.f32.mrf.mxu1 }
 0x114   : > { %v628_v54 = vadd.f32 %v627_v57, %v562_v56  ;;  %v692_v55 = vpop.f32.mrf.mxu2 }
 0x115   : > { %v757_v58 = vpop.f32.mrf.mxu3  ;;  %821 = vmatmul.f32.gmra.mxu0 %v1992_v6 }
 0x116   : > { %v758_v59 = vadd.f32 %v757_v58, %v692_v55  ;;  %1269 = vst [vmem:[%s2067_s19 + $0x120] sm:$0xff] %v628_v54  ;;  %886 = vmatmul.f32.gmra.mxu1 %v1996_v7 }
 0x118   : > { %1270 = vst [vmem:[%s2067_s19 + $0x128] sm:$0xff] %v758_v59 }
 0x119   : > { %954 = vmatmul.f32.gmra.mxu2 %v2004_v14 }
 0x11a   : > { %1019 = vmatmul.f32.gmra.mxu3 %v2008_v15  ;;  %v565_v0 = vpop.f32.mrf.mxu0 }
 0x11b   : > { %v630_v1 = vpop.f32.mrf.mxu1 }
 0x11c   : > { %v631_v60 = vadd.f32 %v630_v1, %v565_v0  ;;  %v695_v61 = vpop.f32.mrf.mxu2 }
 0x11d   : > { %v760_v62 = vpop.f32.mrf.mxu3  ;;  %824 = vmatmul.f32.gmra.mxu0 %v2004_v14 }
 0x11e   : > { %v761_v63 = vadd.f32 %v760_v62, %v695_v61  ;;  %1273 = vst [vmem:[%s2067_s19 + $0x140] sm:$0xff] %v631_v60  ;;  %889 = vmatmul.f32.gmra.mxu1 %v2008_v15 }
 0x120   : > { %1274 = vst [vmem:[%s2067_s19 + $0x148] sm:$0xff] %v761_v63 }
 0x121   : > { %957 = vmatmul.f32.gmra.mxu2 %v2016_v20 }
 0x122   : > { %1022 = vmatmul.f32.gmra.mxu3 %v2020_v21  ;;  %v568_v6 = vpop.f32.mrf.mxu0 }
 0x123   : > { %v633_v7 = vpop.f32.mrf.mxu1 }
 0x124   : > { %v634_v2 = vadd.f32 %v633_v7, %v568_v6  ;;  %v698_v3 = vpop.f32.mrf.mxu2 }
 0x125   : > { %v763_v10 = vpop.f32.mrf.mxu3  ;;  %827 = vmatmul.f32.gmra.mxu0 %v2016_v20 }
 0x126   : > { %v764_v11 = vadd.f32 %v763_v10, %v698_v3  ;;  %1277 = vst [vmem:[%s2067_s19 + $0x160] sm:$0xff] %v634_v2  ;;  %892 = vmatmul.f32.gmra.mxu1 %v2020_v21 }
 0x128   : > { %1278 = vst [vmem:[%s2067_s19 + $0x168] sm:$0xff] %v764_v11 }
 0x129   : > { %960 = vmatmul.f32.gmra.mxu2 %v2028_v28 }
 0x12a   : > { %1025 = vmatmul.f32.gmra.mxu3 %v2032_v29  ;;  %v571_v14 = vpop.f32.mrf.mxu0 }
 0x12b   : > { %v636_v15 = vpop.f32.mrf.mxu1 }
 0x12c   : > { %v637_v4 = vadd.f32 %v636_v15, %v571_v14  ;;  %v701_v5 = vpop.f32.mrf.mxu2 }
 0x12d   : > { %v766_v8 = vpop.f32.mrf.mxu3  ;;  %830 = vmatmul.f32.gmra.mxu0 %v2028_v28 }
 0x12e   : > { %v767_v9 = vadd.f32 %v766_v8, %v701_v5  ;;  %1281 = vst [vmem:[%s2067_s19 + $0x180] sm:$0xff] %v637_v4  ;;  %895 = vmatmul.f32.gmra.mxu1 %v2032_v29 }
 0x130   : > { %1282 = vst [vmem:[%s2067_s19 + $0x188] sm:$0xff] %v767_v9 }
 0x131   : > { %963 = vmatmul.f32.gmra.mxu2 %v2040_v34 }
 0x132   : > { %1028 = vmatmul.f32.gmra.mxu3 %v2042_v35  ;;  %v574_v20 = vpop.f32.mrf.mxu0 }
 0x133   : > { %v639_v21 = vpop.f32.mrf.mxu1 }
 0x134   : > { %v640_v24 = vadd.f32 %v639_v21, %v574_v20  ;;  %v704_v25 = vpop.f32.mrf.mxu2 }
 0x135   : > { %v769_v12 = vpop.f32.mrf.mxu3  ;;  %833 = vmatmul.f32.gmra.mxu0 %v2040_v34 }
 0x136   : > { %v770_v13 = vadd.f32 %v769_v12, %v704_v25  ;;  %1285 = vst [vmem:[%s2067_s19 + $0x1a0] sm:$0xff] %v640_v24  ;;  %898 = vmatmul.f32.gmra.mxu1 %v2042_v35 }
 0x138   : > { %1286 = vst [vmem:[%s2067_s19 + $0x1a8] sm:$0xff] %v770_v13 }
 0x139   : > { %966 = vmatmul.f32.gmra.mxu2 %v2048_v36 }
 0x13a   : > { %1031 = vmatmul.f32.gmra.mxu3 %v2050_v37  ;;  %v577_v28 = vpop.f32.mrf.mxu0 }
 0x13b   : > { %v642_v29 = vpop.f32.mrf.mxu1 }
 0x13c   : > { %v643_v16 = vadd.f32 %v642_v29, %v577_v28  ;;  %v707_v17 = vpop.f32.mrf.mxu2 }
 0x13d   : > { %v772_v32 = vpop.f32.mrf.mxu3  ;;  %836 = vmatmul.f32.gmra.mxu0 %v2048_v36 }
 0x13e   : > { %v773_v33 = vadd.f32 %v772_v32, %v707_v17  ;;  %1289 = vst [vmem:[%s2067_s19 + $0x1c0] sm:$0xff] %v643_v16  ;;  %901 = vmatmul.f32.gmra.mxu1 %v2050_v37 }
 0x140   : > { %1290 = vst [vmem:[%s2067_s19 + $0x1c8] sm:$0xff] %v773_v33 }
 0x141   : > { %969 = vmatmul.f32.gmra.mxu2 %v2056_v40 }
 0x142   : > { %1034 = vmatmul.f32.gmra.mxu3 %v2058_v41  ;;  %v580_v34 = vpop.f32.mrf.mxu0 }
 0x143   : > { %v645_v35 = vpop.f32.mrf.mxu1 }
 0x144   : > { %v646_v18 = vadd.f32 %v645_v35, %v580_v34  ;;  %v710_v19 = vpop.f32.mrf.mxu2 }
 0x145   : > { %v775_v22 = vpop.f32.mrf.mxu3  ;;  %839 = vmatmul.f32.gmra.mxu0 %v2056_v40 }
 0x146   : > { %v776_v23 = vadd.f32 %v775_v22, %v710_v19  ;;  %1293 = vst [vmem:[%s2067_s19 + $0x1e0] sm:$0xff] %v646_v18  ;;  %904 = vmatmul.f32.gmra.mxu1 %v2058_v41 }
 0x148   : > { %1294 = vst [vmem:[%s2067_s19 + $0x1e8] sm:$0xff] %v776_v23 }
 0x14a   : > { %v795_v36 = vpop.f32.mrf.mxu0 }
 0x14b   : > { %v860_v37 = vpop.f32.mrf.mxu1 }
 0x14c   : > { %v861_v38 = vadd.f32 %v860_v37, %v795_v36  ;;  %v925_v39 = vpop.f32.mrf.mxu2 }
 0x14d   : > { %v990_v26 = vpop.f32.mrf.mxu3 }
 0x14e   : > { %v991_v27 = vadd.f32 %v990_v26, %v925_v39  ;;  %1235 = vst [vmem:[%s2067_s19 + $0x10] sm:$0xff] %v861_v38 }
 0x150   : > { %1236 = vst [vmem:[%s2067_s19 + $0x18] sm:$0xff] %v991_v27 }
 0x152   : > { %v798_v30 = vpop.f32.mrf.mxu0 }
 0x153   : > { %v863_v31 = vpop.f32.mrf.mxu1 }
 0x154   : > { %v864_v44 = vadd.f32 %v863_v31, %v798_v30  ;;  %v928_v45 = vpop.f32.mrf.mxu2 }
 0x155   : > { %v993_v40 = vpop.f32.mrf.mxu3 }
 0x156   : > { %v994_v42 = vadd.f32 %v993_v40, %v928_v45  ;;  %1239 = vst [vmem:[%s2067_s19 + $0x30] sm:$0xff] %v864_v44 }
 0x158   : > { %1240 = vst [vmem:[%s2067_s19 + $0x38] sm:$0xff] %v994_v42 }
 0x15a   : > { %v801_v41 = vpop.f32.mrf.mxu0 }
 0x15b   : > { %v866_v43 = vpop.f32.mrf.mxu1 }
 0x15c   : > { %v867_v46 = vadd.f32 %v866_v43, %v801_v41  ;;  %v931_v47 = vpop.f32.mrf.mxu2 }
 0x15d   : > { %v996_v50 = vpop.f32.mrf.mxu3 }
 0x15e   : > { %v997_v51 = vadd.f32 %v996_v50, %v931_v47  ;;  %1243 = vst [vmem:[%s2067_s19 + $0x50] sm:$0xff] %v867_v46 }
 0x160   : > { %1244 = vst [vmem:[%s2067_s19 + $0x58] sm:$0xff] %v997_v51 }
 0x162   : > { %v804_v48 = vpop.f32.mrf.mxu0 }
 0x163   : > { %v869_v49 = vpop.f32.mrf.mxu1 }
 0x164   : > { %v870_v52 = vadd.f32 %v869_v49, %v804_v48  ;;  %v934_v53 = vpop.f32.mrf.mxu2 }
 0x165   : > { %v999_v56 = vpop.f32.mrf.mxu3 }
 0x166   : > { %v1000_v57 = vadd.f32 %v999_v56, %v934_v53  ;;  %1247 = vst [vmem:[%s2067_s19 + $0x70] sm:$0xff] %v870_v52 }
 0x168   : > { %1248 = vst [vmem:[%s2067_s19 + $0x78] sm:$0xff] %v1000_v57 }
 0x16a   : > { %v807_v54 = vpop.f32.mrf.mxu0 }
 0x16b   : > { %v872_v55 = vpop.f32.mrf.mxu1 }
 0x16c   : > { %v873_v58 = vadd.f32 %v872_v55, %v807_v54  ;;  %v937_v59 = vpop.f32.mrf.mxu2 }
 0x16d   : > { %v1002_v0 = vpop.f32.mrf.mxu3 }
 0x16e   : > { %v1003_v1 = vadd.f32 %v1002_v0, %v937_v59  ;;  %1251 = vst [vmem:[%s2067_s19 + $0x90] sm:$0xff] %v873_v58 }
 0x170   : > { %1252 = vst [vmem:[%s2067_s19 + $0x98] sm:$0xff] %v1003_v1 }
 0x172   : > { %v810_v60 = vpop.f32.mrf.mxu0 }
 0x173   : > { %v875_v61 = vpop.f32.mrf.mxu1 }
 0x174   : > { %v876_v62 = vadd.f32 %v875_v61, %v810_v60  ;;  %v940_v63 = vpop.f32.mrf.mxu2 }
 0x175   : > { %v1005_v6 = vpop.f32.mrf.mxu3 }
 0x176   : > { %v1006_v7 = vadd.f32 %v1005_v6, %v940_v63  ;;  %1255 = vst [vmem:[%s2067_s19 + $0xb0] sm:$0xff] %v876_v62 }
 0x178   : > { %1256 = vst [vmem:[%s2067_s19 + $0xb8] sm:$0xff] %v1006_v7 }
 0x17a   : > { %v813_v2 = vpop.f32.mrf.mxu0 }
 0x17b   : > { %v878_v3 = vpop.f32.mrf.mxu1 }
 0x17c   : > { %v879_v10 = vadd.f32 %v878_v3, %v813_v2  ;;  %v943_v11 = vpop.f32.mrf.mxu2 }
 0x17d   : > { %v1008_v14 = vpop.f32.mrf.mxu3 }
 0x17e   : > { %v1009_v15 = vadd.f32 %v1008_v14, %v943_v11  ;;  %1259 = vst [vmem:[%s2067_s19 + $0xd0] sm:$0xff] %v879_v10 }
 0x180   : > { %1260 = vst [vmem:[%s2067_s19 + $0xd8] sm:$0xff] %v1009_v15 }
 0x182   : > { %v816_v4 = vpop.f32.mrf.mxu0 }
 0x183   : > { %v881_v5 = vpop.f32.mrf.mxu1 }
 0x184   : > { %v882_v8 = vadd.f32 %v881_v5, %v816_v4  ;;  %v946_v9 = vpop.f32.mrf.mxu2 }
 0x185   : > { %v1011_v20 = vpop.f32.mrf.mxu3 }
 0x186   : > { %v1012_v21 = vadd.f32 %v1011_v20, %v946_v9  ;;  %1263 = vst [vmem:[%s2067_s19 + $0xf0] sm:$0xff] %v882_v8 }
 0x188   : > { %1264 = vst [vmem:[%s2067_s19 + $0xf8] sm:$0xff] %v1012_v21 }
 0x18a   : > { %v819_v24 = vpop.f32.mrf.mxu0 }
 0x18b   : > { %v884_v25 = vpop.f32.mrf.mxu1 }
 0x18c   : > { %v885_v12 = vadd.f32 %v884_v25, %v819_v24  ;;  %v949_v13 = vpop.f32.mrf.mxu2 }
 0x18d   : > { %v1014_v28 = vpop.f32.mrf.mxu3 }
 0x18e   : > { %v1015_v29 = vadd.f32 %v1014_v28, %v949_v13  ;;  %1267 = vst [vmem:[%s2067_s19 + $0x110] sm:$0xff] %v885_v12 }
 0x190   : > { %1268 = vst [vmem:[%s2067_s19 + $0x118] sm:$0xff] %v1015_v29 }
 0x192   : > { %v822_v16 = vpop.f32.mrf.mxu0 }
 0x193   : > { %v887_v17 = vpop.f32.mrf.mxu1 }
 0x194   : > { %v888_v32 = vadd.f32 %v887_v17, %v822_v16  ;;  %v952_v33 = vpop.f32.mrf.mxu2 }
 0x195   : > { %v1017_v34 = vpop.f32.mrf.mxu3 }
 0x196   : > { %v1018_v35 = vadd.f32 %v1017_v34, %v952_v33  ;;  %1271 = vst [vmem:[%s2067_s19 + $0x130] sm:$0xff] %v888_v32 }
 0x198   : > { %1272 = vst [vmem:[%s2067_s19 + $0x138] sm:$0xff] %v1018_v35 }
 0x19a   : > { %v825_v18 = vpop.f32.mrf.mxu0 }
 0x19b   : > { %v890_v19 = vpop.f32.mrf.mxu1 }
 0x19c   : > { %v891_v22 = vadd.f32 %v890_v19, %v825_v18  ;;  %v955_v23 = vpop.f32.mrf.mxu2 }
 0x19d   : > { %v1020_v36 = vpop.f32.mrf.mxu3 }
 0x19e   : > { %v1021_v37 = vadd.f32 %v1020_v36, %v955_v23  ;;  %1275 = vst [vmem:[%s2067_s19 + $0x150] sm:$0xff] %v891_v22 }
 0x1a0   : > { %1276 = vst [vmem:[%s2067_s19 + $0x158] sm:$0xff] %v1021_v37 }
 0x1a2   : > { %v828_v38 = vpop.f32.mrf.mxu0 }
 0x1a3   : > { %v893_v39 = vpop.f32.mrf.mxu1 }
 0x1a4   : > { %v894_v26 = vadd.f32 %v893_v39, %v828_v38  ;;  %v958_v27 = vpop.f32.mrf.mxu2 }
 0x1a5   : > { %v1023_v30 = vpop.f32.mrf.mxu3 }
 0x1a6   : > { %v1024_v31 = vadd.f32 %v1023_v30, %v958_v27  ;;  %1279 = vst [vmem:[%s2067_s19 + $0x170] sm:$0xff] %v894_v26 }
 0x1a8   : > { %1280 = vst [vmem:[%s2067_s19 + $0x178] sm:$0xff] %v1024_v31 }
 0x1aa   : > { %v831_v44 = vpop.f32.mrf.mxu0 }
 0x1ab   : > { %v896_v45 = vpop.f32.mrf.mxu1 }
 0x1ac   : > { %v897_v40 = vadd.f32 %v896_v45, %v831_v44  ;;  %v961_v42 = vpop.f32.mrf.mxu2 }
 0x1ad   : > { %v1026_v41 = vpop.f32.mrf.mxu3 }
 0x1ae   : > { %v1027_v43 = vadd.f32 %v1026_v41, %v961_v42  ;;  %1283 = vst [vmem:[%s2067_s19 + $0x190] sm:$0xff] %v897_v40 }
 0x1b0   : > { %1284 = vst [vmem:[%s2067_s19 + $0x198] sm:$0xff] %v1027_v43 }
 0x1b2   : > { %v834_v46 = vpop.f32.mrf.mxu0 }
 0x1b3   : > { %v899_v47 = vpop.f32.mrf.mxu1 }
 0x1b4   : > { %v900_v50 = vadd.f32 %v899_v47, %v834_v46  ;;  %v964_v51 = vpop.f32.mrf.mxu2 }
 0x1b5   : > { %v1029_v48 = vpop.f32.mrf.mxu3 }
 0x1b6   : > { %v1030_v49 = vadd.f32 %v1029_v48, %v964_v51  ;;  %1287 = vst [vmem:[%s2067_s19 + $0x1b0] sm:$0xff] %v900_v50 }
 0x1b8   : > { %1288 = vst [vmem:[%s2067_s19 + $0x1b8] sm:$0xff] %v1030_v49 }
 0x1ba   : > { %v837_v52 = vpop.f32.mrf.mxu0 }
 0x1bb   : > { %v902_v53 = vpop.f32.mrf.mxu1 }
 0x1bc   : > { %v903_v56 = vadd.f32 %v902_v53, %v837_v52  ;;  %v967_v57 = vpop.f32.mrf.mxu2 }
 0x1bd   : > { %v1032_v54 = vpop.f32.mrf.mxu3 }
 0x1be   : > { %v1033_v55 = vadd.f32 %v1032_v54, %v967_v57  ;;  %1291 = vst [vmem:[%s2067_s19 + $0x1d0] sm:$0xff] %v903_v56 }
 0x1c0   : > { %1292 = vst [vmem:[%s2067_s19 + $0x1d8] sm:$0xff] %v1033_v55 }
 0x1c2   : > { %v840_v58 = vpop.f32.mrf.mxu0 }
 0x1c3   : > { %v905_v59 = vpop.f32.mrf.mxu1 }
 0x1c4   : > { %v906_v0 = vadd.f32 %v905_v59, %v840_v58  ;;  %v970_v1 = vpop.f32.mrf.mxu2 }
 0x1c5   : > { %v1035_v60 = vpop.f32.mrf.mxu3 }
 0x1c6   : > { %v1036_v61 = vadd.f32 %v1035_v60, %v970_v1  ;;  %1295 = vst [vmem:[%s2067_s19 + $0x1f0] sm:$0xff] %v906_v0 }
 0x1c8   : > { %1296 = vst [vmem:[%s2067_s19 + $0x1f8] sm:$0xff] %v1036_v61 }
 0x1c9   : > { %1610 = shalt.err (!%p1607_p0)
}
 0x1ca   : > { %s1677_s30 = smov 512   ;;  %s1678_s6 = smov 1024  }
 0x1cb   : > { %s1679_s7 = smov 32  }
 0x1cc   : > { %1448 = dma.vmem_to_hbm [thread:$0]  (%p1774_p5), %s1314_s22, 8192, %s1316_s23, %s1298_s12, %s1677_s30, %s1678_s6, %s1679_s7  }
 0x1cd PF: > { %s1330_s17 = sand.u32 1, %s1649_s9   ;;  %p1459_p3 = pnand %p1427_p11, %p1744_p6 }
 0x1ce   : > { %s1331_s19 = scalar_lea.sflag [#allocation5], %s1330_s17 }
 0x1cf   : > { %p1460_p7 = pneg %p1459_p3 }
 0x1d1   : > { %1644 = dma.done.wait (%p1460_p7), %s1331_s19, 8192  }
 0x1d2   : > { %1646 = vsyncadd (%p1460_p7), %s1331_s19, 4294959104  ;;  %s19_s14 = sadd.s32 1, %s1669_s14   ;;  %s2244_s9 = smov %s1653_s10 }
 0x1d3   : > { %p16_p9 = scmp.ge.s32.totalorder %s19_s14, 4   ;;  %s2245_s10 = smov %s1657_s11 }
 0x1d4   : > { %s2246_s11 = smov %s1783_s8  ;;  %s2247_s12 = smov %s1665_s13 }
 0x1d5   : > { %s2248_s13 = smov %s2250_s29  ;;  %18 = sbr.rel (!%p16_p9) target bundleno = 7 (0x7), region = 87 }
 0x1da   :  { %1337 = vsyncpa [#allocation4], 1 }
 0x1db   :  { %1339 = vsyncpa [#allocation4 + $0x1], 1 }
 0x1dc   :  { %1340 = vsyncpa [#allocation7], 1 }
 0x1dd   :  { %1342 = vsyncpa [#allocation7 + $0x1], 1 }
 0x1de   :  { %1343 = vsyncpa [#allocation5], 1 }
 0x1df   :  { %1345 = vsyncpa [#allocation5 + $0x1], 1 }

</bundles_post_ra>
